<compile_context>
chip_gen: v5e
topology: v5e:2x2
jax: 0.10.0
libtpu: 0.0.40
codegen_flags: <defaults>
</compile_context>

<pallas_src>
import math

import jax
import jax.numpy as jnp
from jax.experimental import pallas as pl
from jax.experimental.pallas import tpu as pltpu

# Reference floor: log(clip(sigmoid(d), 1e-7, 1-1e-7) + 1e-7) bottoms out at log(2e-7).
_LOG_FLOOR = math.log(2e-7)

# ~0.35us per grid step expressed in "tile elements" for the tile-size cost model.
_STEP_OVERHEAD_ELEMS = 150_000


def _accumulate_tile(yp_col_ref, yt_col_ref, yp_row_ref, yt_row_ref,
                     num_ref, den_ref, *, with_swap, init):
    """Compute one (T, T) tile's masked log-sigmoid contributions.

    yp_col/yt_col: (T, 1) blocks (rows r of the pair matrix).
    yp_row/yt_row: (1, T) blocks (cols c of the pair matrix).
    num_ref/den_ref: (1, 1, T) lane-dense accumulators, resident across j.
    """
    yp_col = yp_col_ref[...]                   # (T, 1)
    yt_col = yt_col_ref[...]                   # (T, 1)
    yp_row = yp_row_ref[...]                   # (1, T)
    yt_row = yt_row_ref[...]                   # (1, T)

    # Full-matrix entry [r, c] of this tile:
    #   diff_true[r, c] = y_true[c] - y_true[r],  d[r, c] = y_pred[c] - y_pred[r]
    diff_true = yt_row - yt_col                # (T, T)
    d = yp_row - yp_col                        # (T, T)

    # log sigmoid(d) with 2 EUP ops (exp + log); reference clamp floor applied.
    logsig = jnp.minimum(d, 0.0) - jnp.log(1.0 + jnp.exp(-jnp.abs(d)))
    logp = jnp.maximum(logsig, _LOG_FLOOR)

    # NaN-padded y_true: padded rows/cols fail both (>0) and (<0) -> excluded.
    cond = diff_true > 0.0
    contrib = jnp.where(cond, logp, 0.0)
    count = cond.astype(jnp.float32)

    if with_swap:
        # Swapped orientation (matrix entry [c, r]): log sigma(-d) = log sigma(d) - d.
        logp_s = jnp.maximum(logsig - d, _LOG_FLOOR)
        cond_s = diff_true < 0.0
        contrib = contrib + jnp.where(cond_s, logp_s, 0.0)
        count = count + cond_s.astype(jnp.float32)

    # Sublane-only reduction (axis=0); lanes stay unreduced -> (1, 1, T).
    num_part = jnp.sum(contrib, axis=0, keepdims=True)[None]
    den_part = jnp.sum(count, axis=0, keepdims=True)[None]
    if init:
        num_ref[...] = num_part
        den_ref[...] = den_part
    else:
        num_ref[...] = num_ref[...] + num_part
        den_ref[...] = den_ref[...] + den_part


def _ranknet_kernel(yp_col_ref, yt_col_ref, yp_row_ref, yt_row_ref,
                    num_ref, den_ref):
    i = pl.program_id(0)
    j = pl.program_id(1)

    # Diagonal tile: the first processed j for this i-block. Initializes the
    # resident accumulators; a single orientation covers the whole block.
    @pl.when(j == i)
    def _():
        _accumulate_tile(yp_col_ref, yt_col_ref, yp_row_ref, yt_row_ref,
                         num_ref, den_ref, with_swap=False, init=True)

    # Strict upper-triangular tile: also fold in the swapped orientation so
    # tiles with j < i never need to be computed (antisymmetry).
    @pl.when(j > i)
    def _():
        _accumulate_tile(yp_col_ref, yt_col_ref, yp_row_ref, yt_row_ref,
                         num_ref, den_ref, with_swap=True, init=False)


def _pick_tile(n, cap):
    """Square tile size T (multiple of 128, <= cap) via a small cost model.

    cost(T) ~ (#triangular tiles) * (T^2 elements + per-step fixed overhead).
    Among near-optimal candidates the smallest T is preferred so the i-grid
    gets >= 2 blocks where that is ~free (lets v7x use both TensorCores).
    """
    cap = max(128, (cap // 128) * 128)
    cands = []
    t = 128
    while t <= cap:
        g = -(-n // t)
        ntiles = g * (g + 1) // 2
        cands.append((ntiles * (t * t + _STEP_OVERHEAD_ELEMS), t))
        t += 128
    best_cost = min(c for c, _ in cands)
    for cost, t in cands:          # ascending t -> first hit is the smallest T
        if cost <= 1.05 * best_cost:
            return t
    return cands[-1][1]


def ranknet_1d_loss(y_pred, y_true, *, tile_cap=1024):
    """Pallas implementation of RankNet1DLoss.forward (model=None, l2_lambda=0)."""
    assert y_pred.ndim == 1 and y_true.ndim == 1, "Input tensors must be 1D"
    n = y_pred.shape[0]

    t = _pick_tile(n, tile_cap)
    g = -(-n // t)
    npad = g * t
    pad = npad - n

    yp = jnp.pad(y_pred.astype(jnp.float32), (0, pad))
    # NaN padding on y_true: padded rows/cols fail both strict comparisons in
    # the kernel, so no explicit validity mask is needed.
    yt = jnp.pad(y_true.astype(jnp.float32), (0, pad), constant_values=jnp.nan)

    yp_col, yt_col = yp[:, None], yt[:, None]     # (npad, 1)
    yp_row, yt_row = yp[None, :], yt[None, :]     # (1, npad)

    num_out, den_out = pl.pallas_call(
        _ranknet_kernel,
        grid=(g, g),
        in_specs=[
            pl.BlockSpec((t, 1), lambda i, j: (i, 0)),    # yp_col
            pl.BlockSpec((t, 1), lambda i, j: (i, 0)),    # yt_col
            pl.BlockSpec((1, t), lambda i, j: (0, j)),    # yp_row
            pl.BlockSpec((1, t), lambda i, j: (0, j)),    # yt_row
        ],
        out_specs=[
            pl.BlockSpec((1, 1, t), lambda i, j: (i, 0, 0)),   # num partials
            pl.BlockSpec((1, 1, t), lambda i, j: (i, 0, 0)),   # den partials
        ],
        out_shape=(
            jax.ShapeDtypeStruct((g, 1, t), jnp.float32),
            jax.ShapeDtypeStruct((g, 1, t), jnp.float32),
        ),
        compiler_params=pltpu.CompilerParams(
            dimension_semantics=("parallel", "arbitrary"),
            vmem_limit_bytes=48 * 1024 * 1024),
    )(yp_col, yt_col, yp_row, yt_row)

    # Single cross-lane / cross-block reduction, done once in the wrapper.
    num = jnp.sum(num_out)
    den = jnp.sum(den_out)
    return -num / (den + 1e-7)


def _reference(y_pred, y_true):
    """Pure-JAX reference mirroring the PyTorch forward, for sanity checking."""
    diff_true = y_true[None, :] - y_true[:, None]
    diff_pred = y_pred[None, :] - y_pred[:, None]
    mask = (diff_true > 0).astype(jnp.float32)
    p = jnp.clip(jax.nn.sigmoid(diff_pred), 1e-7, 1 - 1e-7)
    bce = mask * jnp.log(p + 1e-7) + (1 - mask) * jnp.log(1 - p + 1e-7)
    return -jnp.sum(bce * mask) / (jnp.sum(mask) + 1e-7)


if __name__ == "__main__":
    key = jax.random.PRNGKey(0)
    k1, k2, k3, k4 = jax.random.split(key, 4)

    # Small case: single heavily NaN-padded 128x128 tile.
    yp1 = jax.random.normal(k1, (8,), dtype=jnp.float32)
    yt1 = jax.random.normal(k2, (8,), dtype=jnp.float32)
    loss1 = jax.block_until_ready(ranknet_1d_loss(yp1, yt1))
    ref1 = _reference(yp1, yt1)
    assert jnp.allclose(loss1, ref1, rtol=1e-4, atol=1e-5), (loss1, ref1)

    # Medium case, default cap: cost model picks a single 384x384 diagonal tile.
    yp2 = jax.random.normal(k3, (300,), dtype=jnp.float32)
    yt2 = jax.random.normal(k4, (300,), dtype=jnp.float32)
    loss2 = jax.block_until_ready(ranknet_1d_loss(yp2, yt2))
    ref2 = _reference(yp2, yt2)
    assert jnp.allclose(loss2, ref2, rtol=1e-4, atol=1e-5), (loss2, ref2)

    # Same data, forced 128 tiles -> 3x3 block grid: exercises the triangular
    # skip, the swapped-orientation off-diagonal path, resident per-i
    # accumulators, and NaN padding across tile boundaries.
    loss3 = jax.block_until_ready(ranknet_1d_loss(yp2, yt2, tile_cap=128))
    assert jnp.allclose(loss3, ref2, rtol=1e-4, atol=1e-5), (loss3, ref2)

    print("KERNEL_OK")
</pallas_src>

<mosaic_0001>
module attributes {stable_mosaic.version = 11 : i64} {
  func.func @_ranknet_kernel(%arg0: i32, %arg1: i32, %arg2: memref<128x1xf32, #tpu.memory_space<vmem>>, %arg3: memref<128x1xf32, #tpu.memory_space<vmem>>, %arg4: memref<1x128xf32, #tpu.memory_space<vmem>>, %arg5: memref<1x128xf32, #tpu.memory_space<vmem>>, %arg6: memref<1x1x128xf32, #tpu.memory_space<vmem>>, %arg7: memref<1x1x128xf32, #tpu.memory_space<vmem>>) attributes {dimension_semantics = [#tpu.dimension_semantics<parallel>, #tpu.dimension_semantics<arbitrary>], iteration_bounds = array<i64: 1, 1>, scalar_prefetch = 0 : i64, scratch_operands = 0 : i64, tpu.core_type = #tpu.core_type<tc>, window_params = [{transform_indices = @transform_0, window_bounds = array<i64: 128, 1>}, {transform_indices = @transform_1, window_bounds = array<i64: 128, 1>}, {transform_indices = @transform_2, window_bounds = array<i64: 1, 128>}, {transform_indices = @transform_3, window_bounds = array<i64: 1, 128>}, {transform_indices = @transform_4, window_bounds = array<i64: 1, 1, 128>}, {transform_indices = @transform_5, window_bounds = array<i64: 1, 1, 128>}]} {
    %0 = arith.cmpi eq, %arg1, %arg0 : i32
    %1 = arith.extui %0 : i1 to i32
    %c0_i32 = arith.constant 0 : i32
    %2 = arith.cmpi ne, %1, %c0_i32 : i32
    scf.if %2 {
      %c0 = arith.constant 0 : index
      %c0_1 = arith.constant 0 : index
      %6 = vector.load %arg2[%c0, %c0_1] : memref<128x1xf32, #tpu.memory_space<vmem>>, vector<128x1xf32>
      %c0_2 = arith.constant 0 : index
      %c0_3 = arith.constant 0 : index
      %7 = vector.load %arg3[%c0_2, %c0_3] : memref<128x1xf32, #tpu.memory_space<vmem>>, vector<128x1xf32>
      %c0_4 = arith.constant 0 : index
      %c0_5 = arith.constant 0 : index
      %8 = vector.load %arg4[%c0_4, %c0_5] : memref<1x128xf32, #tpu.memory_space<vmem>>, vector<1x128xf32>
      %c0_6 = arith.constant 0 : index
      %c0_7 = arith.constant 0 : index
      %9 = vector.load %arg5[%c0_6, %c0_7] : memref<1x128xf32, #tpu.memory_space<vmem>>, vector<1x128xf32>
      %10 = vector.broadcast %9 : vector<1x128xf32> to vector<128x128xf32>
      %11 = vector.broadcast %7 : vector<128x1xf32> to vector<128x128xf32>
      %12 = arith.subf %10, %11 : vector<128x128xf32>
      %13 = vector.broadcast %8 : vector<1x128xf32> to vector<128x128xf32>
      %14 = vector.broadcast %6 : vector<128x1xf32> to vector<128x128xf32>
      %15 = arith.subf %13, %14 : vector<128x128xf32>
      %cst = arith.constant 0.000000e+00 : f32
      %16 = vector.broadcast %cst : f32 to vector<128x128xf32>
      %17 = arith.minimumf %15, %16 : vector<128x128xf32>
      %18 = math.absf %15 : vector<128x128xf32>
      %cst_8 = arith.constant 0.000000e+00 : f32
      %19 = vector.broadcast %cst_8 : f32 to vector<128x128xf32>
      %20 = arith.subf %19, %18 : vector<128x128xf32>
      %21 = math.exp %20 : vector<128x128xf32>
      %cst_9 = arith.constant 1.000000e+00 : f32
      %22 = vector.broadcast %cst_9 : f32 to vector<128x128xf32>
      %23 = arith.addf %22, %21 : vector<128x128xf32>
      %24 = math.log %23 : vector<128x128xf32>
      %25 = arith.subf %17, %24 : vector<128x128xf32>
      %cst_10 = arith.constant -15.4249487 : f32
      %26 = vector.broadcast %cst_10 : f32 to vector<128x128xf32>
      %27 = arith.maximumf %25, %26 : vector<128x128xf32>
      %cst_11 = arith.constant 0.000000e+00 : f32
      %28 = vector.broadcast %cst_11 : f32 to vector<128x128xf32>
      %29 = arith.cmpf ogt, %12, %28 : vector<128x128xf32>
      %cst_12 = arith.constant 0.000000e+00 : f32
      %30 = vector.broadcast %cst_12 : f32 to vector<128x128xf32>
      %31 = arith.select %29, %27, %30 : vector<128x128xi1>, vector<128x128xf32>
      %32 = arith.extui %29 : vector<128x128xi1> to vector<128x128xi32>
      %33 = arith.sitofp %32 : vector<128x128xi32> to vector<128x128xf32>
      %cst_13 = arith.constant dense<0.000000e+00> : vector<128xf32>
      %34 = vector.multi_reduction <add>, %31, %cst_13 [0] : vector<128x128xf32> to vector<128xf32>
      %35 = vector.shape_cast %34 : vector<128xf32> to vector<1x128xf32>
      %36 = vector.shape_cast %35 : vector<1x128xf32> to vector<1x1x128xf32>
      %cst_14 = arith.constant dense<0.000000e+00> : vector<128xf32>
      %37 = vector.multi_reduction <add>, %33, %cst_14 [0] : vector<128x128xf32> to vector<128xf32>
      %38 = vector.shape_cast %37 : vector<128xf32> to vector<1x128xf32>
      %39 = vector.shape_cast %38 : vector<1x128xf32> to vector<1x1x128xf32>
      %c0_15 = arith.constant 0 : index
      %c0_16 = arith.constant 0 : index
      %c0_17 = arith.constant 0 : index
      %40 = vector.load %arg6[%c0_15, %c0_16, %c0_17] : memref<1x1x128xf32, #tpu.memory_space<vmem>>, vector<1x1x128xf32>
      tpu.vector_store %arg6[%c0_15, %c0_16, %c0_17], %36 {strides = array<i32>} : memref<1x1x128xf32, #tpu.memory_space<vmem>>, vector<1x1x128xf32>,
      %c0_18 = arith.constant 0 : index
      %c0_19 = arith.constant 0 : index
      %c0_20 = arith.constant 0 : index
      %41 = vector.load %arg7[%c0_18, %c0_19, %c0_20] : memref<1x1x128xf32, #tpu.memory_space<vmem>>, vector<1x1x128xf32>
      tpu.vector_store %arg7[%c0_18, %c0_19, %c0_20], %39 {strides = array<i32>} : memref<1x1x128xf32, #tpu.memory_space<vmem>>, vector<1x1x128xf32>,
    } else {
    }
    %3 = arith.cmpi sgt, %arg1, %arg0 : i32
    %4 = arith.extui %3 : i1 to i32
    %c0_i32_0 = arith.constant 0 : i32
    %5 = arith.cmpi ne, %4, %c0_i32_0 : i32
    scf.if %5 {
      %c0 = arith.constant 0 : index
      %c0_1 = arith.constant 0 : index
      %6 = vector.load %arg2[%c0, %c0_1] : memref<128x1xf32, #tpu.memory_space<vmem>>, vector<128x1xf32>
      %c0_2 = arith.constant 0 : index
      %c0_3 = arith.constant 0 : index
      %7 = vector.load %arg3[%c0_2, %c0_3] : memref<128x1xf32, #tpu.memory_space<vmem>>, vector<128x1xf32>
      %c0_4 = arith.constant 0 : index
      %c0_5 = arith.constant 0 : index
      %8 = vector.load %arg4[%c0_4, %c0_5] : memref<1x128xf32, #tpu.memory_space<vmem>>, vector<1x128xf32>
      %c0_6 = arith.constant 0 : index
      %c0_7 = arith.constant 0 : index
      %9 = vector.load %arg5[%c0_6, %c0_7] : memref<1x128xf32, #tpu.memory_space<vmem>>, vector<1x128xf32>
      %10 = vector.broadcast %9 : vector<1x128xf32> to vector<128x128xf32>
      %11 = vector.broadcast %7 : vector<128x1xf32> to vector<128x128xf32>
      %12 = arith.subf %10, %11 : vector<128x128xf32>
      %13 = vector.broadcast %8 : vector<1x128xf32> to vector<128x128xf32>
      %14 = vector.broadcast %6 : vector<128x1xf32> to vector<128x128xf32>
      %15 = arith.subf %13, %14 : vector<128x128xf32>
      %cst = arith.constant 0.000000e+00 : f32
      %16 = vector.broadcast %cst : f32 to vector<128x128xf32>
      %17 = arith.minimumf %15, %16 : vector<128x128xf32>
      %18 = math.absf %15 : vector<128x128xf32>
      %cst_8 = arith.constant 0.000000e+00 : f32
      %19 = vector.broadcast %cst_8 : f32 to vector<128x128xf32>
      %20 = arith.subf %19, %18 : vector<128x128xf32>
      %21 = math.exp %20 : vector<128x128xf32>
      %cst_9 = arith.constant 1.000000e+00 : f32
      %22 = vector.broadcast %cst_9 : f32 to vector<128x128xf32>
      %23 = arith.addf %22, %21 : vector<128x128xf32>
      %24 = math.log %23 : vector<128x128xf32>
      %25 = arith.subf %17, %24 : vector<128x128xf32>
      %cst_10 = arith.constant -15.4249487 : f32
      %26 = vector.broadcast %cst_10 : f32 to vector<128x128xf32>
      %27 = arith.maximumf %25, %26 : vector<128x128xf32>
      %cst_11 = arith.constant 0.000000e+00 : f32
      %28 = vector.broadcast %cst_11 : f32 to vector<128x128xf32>
      %29 = arith.cmpf ogt, %12, %28 : vector<128x128xf32>
      %cst_12 = arith.constant 0.000000e+00 : f32
      %30 = vector.broadcast %cst_12 : f32 to vector<128x128xf32>
      %31 = arith.select %29, %27, %30 : vector<128x128xi1>, vector<128x128xf32>
      %32 = arith.extui %29 : vector<128x128xi1> to vector<128x128xi32>
      %33 = arith.sitofp %32 : vector<128x128xi32> to vector<128x128xf32>
      %34 = arith.subf %25, %15 : vector<128x128xf32>
      %cst_13 = arith.constant -15.4249487 : f32
      %35 = vector.broadcast %cst_13 : f32 to vector<128x128xf32>
      %36 = arith.maximumf %34, %35 : vector<128x128xf32>
      %cst_14 = arith.constant 0.000000e+00 : f32
      %37 = vector.broadcast %cst_14 : f32 to vector<128x128xf32>
      %38 = arith.cmpf olt, %12, %37 : vector<128x128xf32>
      %cst_15 = arith.constant 0.000000e+00 : f32
      %39 = vector.broadcast %cst_15 : f32 to vector<128x128xf32>
      %40 = arith.select %38, %36, %39 : vector<128x128xi1>, vector<128x128xf32>
      %41 = arith.addf %31, %40 : vector<128x128xf32>
      %42 = arith.extui %38 : vector<128x128xi1> to vector<128x128xi32>
      %43 = arith.sitofp %42 : vector<128x128xi32> to vector<128x128xf32>
      %44 = arith.addf %33, %43 : vector<128x128xf32>
      %cst_16 = arith.constant dense<0.000000e+00> : vector<128xf32>
      %45 = vector.multi_reduction <add>, %41, %cst_16 [0] : vector<128x128xf32> to vector<128xf32>
      %46 = vector.shape_cast %45 : vector<128xf32> to vector<1x128xf32>
      %47 = vector.shape_cast %46 : vector<1x128xf32> to vector<1x1x128xf32>
      %cst_17 = arith.constant dense<0.000000e+00> : vector<128xf32>
      %48 = vector.multi_reduction <add>, %44, %cst_17 [0] : vector<128x128xf32> to vector<128xf32>
      %49 = vector.shape_cast %48 : vector<128xf32> to vector<1x128xf32>
      %50 = vector.shape_cast %49 : vector<1x128xf32> to vector<1x1x128xf32>
      %c0_18 = arith.constant 0 : index
      %c0_19 = arith.constant 0 : index
      %c0_20 = arith.constant 0 : index
      %51 = vector.load %arg6[%c0_18, %c0_19, %c0_20] : memref<1x1x128xf32, #tpu.memory_space<vmem>>, vector<1x1x128xf32>
      %52 = arith.addf %51, %47 : vector<1x1x128xf32>
      %c0_21 = arith.constant 0 : index
      %c0_22 = arith.constant 0 : index
      %c0_23 = arith.constant 0 : index
      %53 = vector.load %arg6[%c0_21, %c0_22, %c0_23] : memref<1x1x128xf32, #tpu.memory_space<vmem>>, vector<1x1x128xf32>
      tpu.vector_store %arg6[%c0_21, %c0_22, %c0_23], %52 {strides = array<i32>} : memref<1x1x128xf32, #tpu.memory_space<vmem>>, vector<1x1x128xf32>,
      %c0_24 = arith.constant 0 : index
      %c0_25 = arith.constant 0 : index
      %c0_26 = arith.constant 0 : index
      %54 = vector.load %arg7[%c0_24, %c0_25, %c0_26] : memref<1x1x128xf32, #tpu.memory_space<vmem>>, vector<1x1x128xf32>
      %55 = arith.addf %54, %50 : vector<1x1x128xf32>
      %c0_27 = arith.constant 0 : index
      %c0_28 = arith.constant 0 : index
      %c0_29 = arith.constant 0 : index
      %56 = vector.load %arg7[%c0_27, %c0_28, %c0_29] : memref<1x1x128xf32, #tpu.memory_space<vmem>>, vector<1x1x128xf32>
      tpu.vector_store %arg7[%c0_27, %c0_28, %c0_29], %55 {strides = array<i32>} : memref<1x1x128xf32, #tpu.memory_space<vmem>>, vector<1x1x128xf32>,
    } else {
    }
    return
  }
  func.func @transform_0(%arg0: i32, %arg1: i32) -> (i32, i32) {
    %c0_i32 = arith.constant 0 : i32
    %c0_i32_0 = arith.constant 0 : i32
    return %arg0, %c0_i32 : i32, i32
  }
  func.func @transform_1(%arg0: i32, %arg1: i32) -> (i32, i32) {
    %c0_i32 = arith.constant 0 : i32
    %c0_i32_0 = arith.constant 0 : i32
    return %arg0, %c0_i32 : i32, i32
  }
  func.func @transform_2(%arg0: i32, %arg1: i32) -> (i32, i32) {
    %c0_i32 = arith.constant 0 : i32
    %c0_i32_0 = arith.constant 0 : i32
    return %c0_i32, %arg1 : i32, i32
  }
  func.func @transform_3(%arg0: i32, %arg1: i32) -> (i32, i32) {
    %c0_i32 = arith.constant 0 : i32
    %c0_i32_0 = arith.constant 0 : i32
    return %c0_i32, %arg1 : i32, i32
  }
  func.func @transform_4(%arg0: i32, %arg1: i32) -> (i32, i32, i32) {
    %c0_i32 = arith.constant 0 : i32
    %c0_i32_0 = arith.constant 0 : i32
    %c0_i32_1 = arith.constant 0 : i32
    return %arg0, %c0_i32, %c0_i32_0 : i32, i32, i32
  }
  func.func @transform_5(%arg0: i32, %arg1: i32) -> (i32, i32, i32) {
    %c0_i32 = arith.constant 0 : i32
    %c0_i32_0 = arith.constant 0 : i32
    %c0_i32_1 = arith.constant 0 : i32
    return %arg0, %c0_i32, %c0_i32_0 : i32, i32, i32
  }
}

</mosaic_0001>

<bundles_post_ra>
// kernel: tpu_custom_call.1
= control target key start
LH: loop header
LB: loop body
LE: loop exit
PB: predicated region body
PF: predicated region fallthrough
CT: control target
= control target key end

     0   :  { %11 = vsyncpa [#allocation3], 0  ;;  %v1366_v3 = vmov 0   ;;  %s1776_s0 = inlined_call_operand.vmem [shape: f32[128,1], index: 0, kind: input, shape index: {}]   ;;  %s1777_s1 = inlined_call_operand.vmem [shape: f32[128,1], index: 1, kind: input, shape index: {}]   ;;  %s1778_s2 = inlined_call_operand.vmem [shape: f32[1,128], index: 2, kind: input, shape index: {}]   ;;  %s1779_s3 = inlined_call_operand.vmem [shape: f32[1,128], index: 3, kind: input, shape index: {}]   ;;  %s1780_s4 = inlined_call_operand.hbm [shape: f32[1,1,128], index: 4, kind: output, shape index: {0}]   ;;  %s1781_s5 = inlined_call_operand.hbm [shape: f32[1,1,128], index: 5, kind: output, shape index: {1}]  }
   0x1   :  { %v45_v0 = vld [vmem:[%s1777_s1 + $0x20] sm:$0xff]  ;;  %v43_v1 = vld [vmem:[%s1777_s1 + $0x10] sm:$0xff]  ;;  %1247 = vset.pattern.permute.xlu2 %v1366_v3  ;;  %1246 = vset.pattern.permute.xlu1 %v1366_v3 }
   0x2   :  { %v41_v2 = vld [vmem:[%s1777_s1] sm:$0xff]  ;;  %1245 = vset.pattern.permute.xlu0 %v1366_v3  ;;  %84 = vperm.xlu2 %1247, %v45_v0  }
   0x3   :  { %74 = vperm.xlu1 %1246, %v43_v1   ;;  %64 = vperm.xlu0 %1245, %v41_v2  }
   0x4   :  { %12 = vsyncpa [#allocation5], 0  ;;  %v46_v4 = vld [vmem:[%s1777_s1 + $0x28] sm:$0xff]  ;;  %v44_v5 = vld [vmem:[%s1777_s1 + $0x18] sm:$0xff]  ;;  %v1367_v51 = vmov 0.0   ;;  %s1179_s11 = sshll.u32 %s1781_s5, 4  ;;  %s1180_s11 = int_to_ptr.hbm [resolvable:$true] %s1179_s11 }
   0x5   :  { %v42_v6 = vld [vmem:[%s1777_s1 + $0x8] sm:$0xff]  ;;  %v49_v7 = vld [vmem:[%s1777_s1 + $0x40] sm:$0xff]  ;;  %v48_v8 = vld [vmem:[%s1777_s1 + $0x38] sm:$0xff]  ;;  %s1369_s5 = smov [#allocation2]   ;;  %s1168_s15 = sshll.u32 %s1780_s4, 4  ;;  %s1169_s15 = int_to_ptr.hbm [resolvable:$true] %s1168_s15 }
   0x6   :  { %v47_v9 = vld [vmem:[%s1777_s1 + $0x30] sm:$0xff]  ;;  %v52_v10 = vld [vmem:[%s1777_s1 + $0x58] sm:$0xff]  ;;  %v50_v12 = vld [vmem:[%s1777_s1 + $0x48] sm:$0xff]  ;;  %s1166_s12 = sshll.u32 %s1369_s5, 4  ;;  %s1167_s12 = int_to_ptr.vmem [resolvable:$true] %s1166_s12 }
   0x7   :  { %v51_v11 = vld [vmem:[%s1777_s1 + $0x50] sm:$0xff]  ;;  %v25_v13 = vld [vmem:[%s1776_s0] sm:$0xff]  ;;  %v54_v14 = vld [vmem:[%s1777_s1 + $0x68] sm:$0xff] }
   0x8   :  { %v53_v15 = vld [vmem:[%s1777_s1 + $0x60] sm:$0xff]  ;;  %v28_v16 = vld [vmem:[%s1776_s0 + $0x18] sm:$0xff]  ;;  %v27_v17 = vld [vmem:[%s1776_s0 + $0x10] sm:$0xff] }
   0x9   :  { %v26_v18 = vld [vmem:[%s1776_s0 + $0x8] sm:$0xff]  ;;  %v31_v19 = vld [vmem:[%s1776_s0 + $0x30] sm:$0xff]  ;;  %v29_v21 = vld [vmem:[%s1776_s0 + $0x20] sm:$0xff] }
   0xa   :  { %89 = vperm.xlu2 %1247, %v46_v4   ;;  %v30_v20 = vld [vmem:[%s1776_s0 + $0x28] sm:$0xff]  ;;  %v33_v23 = vld [vmem:[%s1776_s0 + $0x40] sm:$0xff]  ;;  %v32_v24 = vld [vmem:[%s1776_s0 + $0x38] sm:$0xff] }
   0xb   :  { %79 = vperm.xlu1 %1246, %v44_v5   ;;  %69 = vperm.xlu0 %1245, %v42_v6   ;;  %v34_v22 = vld [vmem:[%s1776_s0 + $0x48] sm:$0xff]  ;;  %v37_v25 = vld [vmem:[%s1776_s0 + $0x60] sm:$0xff]  ;;  %v36_v26 = vld [vmem:[%s1776_s0 + $0x58] sm:$0xff] }
   0xc   :  { %v35_v27 = vld [vmem:[%s1776_s0 + $0x50] sm:$0xff]  ;;  %v40_v28 = vld [vmem:[%s1776_s0 + $0x78] sm:$0xff]  ;;  %v38_v30 = vld [vmem:[%s1776_s0 + $0x68] sm:$0xff] }
   0xd   :  { %v39_v29 = vld [vmem:[%s1776_s0 + $0x70] sm:$0xff]  ;;  %v56_v31 = vld [vmem:[%s1777_s1 + $0x78] sm:$0xff]  ;;  %v1503_v39 = vld [vmem:[%s1779_s3] ss:$0 sm:$0xff] }
   0xe   :  { %v55_v32 = vld [vmem:[%s1777_s1 + $0x70] sm:$0xff]  ;;  %v1510_v45 = vld [vmem:[%s1778_s2] ss:$0 sm:$0xff]  ;;  %s1368_s2 = smov [#allocation4]  }
   0xf   :  { %s1177_s3 = sshll.u32 %s1368_s2, 4  ;;  %s1178_s3 = int_to_ptr.vmem [resolvable:$true] %s1177_s3 }
  0x12   :  { %104 = vperm.xlu2 %1247, %v49_v7  }
  0x13   :  { %99 = vperm.xlu1 %1246, %v48_v8   ;;  %94 = vperm.xlu0 %1245, %v47_v9  }
  0x1a   :  { %119 = vperm.xlu2 %1247, %v52_v10  }
  0x1b   :  { %114 = vperm.xlu1 %1246, %v51_v11   ;;  %109 = vperm.xlu0 %1245, %v50_v12  }
  0x22   :  { %163 = vperm.xlu2 %1247, %v25_v13  }
  0x23   :  { %129 = vperm.xlu1 %1246, %v54_v14   ;;  %124 = vperm.xlu0 %1245, %v53_v15  }
  0x2a   :  { %178 = vperm.xlu2 %1247, %v28_v16  }
  0x2b   :  { %173 = vperm.xlu1 %1246, %v27_v17   ;;  %168 = vperm.xlu0 %1245, %v26_v18  }
  0x32   :  { %193 = vperm.xlu2 %1247, %v31_v19  }
  0x33   :  { %188 = vperm.xlu1 %1246, %v30_v20   ;;  %183 = vperm.xlu0 %1245, %v29_v21  }
  0x3a   :  { %208 = vperm.xlu2 %1247, %v34_v22  }
  0x3b   :  { %203 = vperm.xlu1 %1246, %v33_v23   ;;  %198 = vperm.xlu0 %1245, %v32_v24  }
  0x42   :  { %223 = vperm.xlu2 %1247, %v37_v25  }
  0x43   :  { %218 = vperm.xlu1 %1246, %v36_v26   ;;  %213 = vperm.xlu0 %1245, %v35_v27  }
  0x4a   :  { %238 = vperm.xlu2 %1247, %v40_v28  }
  0x4b   :  { %233 = vperm.xlu1 %1246, %v39_v29   ;;  %228 = vperm.xlu0 %1245, %v38_v30  }
  0x53   :  { %139 = vperm.xlu1 %1246, %v56_v31   ;;  %134 = vperm.xlu0 %1245, %v55_v32  }
  0x5c   :  { %v85_v33 = vpop.permute.xlu2 %84 }
  0x5d   :  { %v146_v62 = vsub.f32 %v1503_v39, %v85_v33 }
  0x5f   :  { %vm1554_vm4 = vcmp.gt.f32.partialorder %v146_v62, 0.0 }
  0x60   :  { %v1197_v13 = vsel %vm1554_vm4, 1.0, %v1367_v51 }
  0x64   :  { %v90_v34 = vpop.permute.xlu2 %89 }
  0x65   :  { %v147_v6 = vsub.f32 %v1503_v39, %v90_v34 }
  0x67   :  { %vm1564_vm5 = vcmp.gt.f32.partialorder %v147_v6, 0.0 }
  0x68   :  { %v1198_v22 = vsel %vm1564_vm5, 1.0, %v1367_v51 }
  0x6c   :  { %v1496_v35 = vpop.permute.xlu2 %104 }
  0x6d   :  { %v150_v29 = vsub.f32 %v1503_v39, %v1496_v35 }
  0x6f   :  { %vm1602_vm8 = vcmp.gt.f32.partialorder %v150_v29, 0.0 }
  0x70   :  { %v1201_v62 = vsel %vm1602_vm8, 1.0, %v1367_v51 }
  0x74   :  { %v1498_v36 = vpop.permute.xlu2 %119 }
  0x75   :  { %v75_v37 = vpop.permute.xlu1 %74  ;;  %v65_v38 = vpop.permute.xlu0 %64 }
  0x76   :  { %v142_v44 = vsub.f32 %v1503_v39, %v65_v38  ;;  %v144_v47 = vsub.f32 %v1503_v39, %v75_v37 }
  0x78   :  { %vm1517_vm1 = vcmp.gt.f32.partialorder %v142_v44, 0.0  ;;  %vm1530_vm2 = vcmp.gt.f32.partialorder %v144_v47, 0.0 }
  0x79   :  { %v1193_v55 = vsel %vm1517_vm1, 1.0, %v1367_v51  ;;  %v1195_v61 = vsel %vm1530_vm2, 1.0, %v1367_v51 }
  0x7c   :  { %v164_v40 = vpop.permute.xlu2 %163 }
  0x7d   :  { %v80_v41 = vpop.permute.xlu1 %79  ;;  %v70_v42 = vpop.permute.xlu0 %69  ;;  %v1522_v49 = vsub.f32 %v1510_v45, %v164_v40 }
  0x7e   :  { %v143_v43 = vsub.f32 %v1503_v39, %v70_v42  ;;  %v145_v57 = vsub.f32 %v1503_v39, %v80_v41 }
  0x7f   :  { %v273_v59 = vand.u32 2147483647, %v1522_v49 }
  0x80   :  { %vm1512_vm0 = vcmp.gt.f32.partialorder %v143_v43, 0.0  ;;  %vm1543_vm3 = vcmp.gt.f32.partialorder %v145_v57, 0.0 }
  0x81   :  { %v1194_v52 = vsel %vm1512_vm0, 1.0, %v1367_v51  ;;  %v289_v1 = vsub.f32 0.0, %v273_v59  ;;  %v1196_v7 = vsel %vm1543_vm3, 1.0, %v1367_v51 }
  0x82   :  { %v502_v58 = vadd.f32 %v1194_v52, %v1193_v55 }
  0x83   :  { %v305_v10 = vmul.f32 1.442695, %v289_v1 }
  0x84   :  { %v179_v50 = vpop.permute.xlu2 %178  ;;  %v503_v0 = vadd.f32 %v1195_v61, %v502_v58 }
  0x85   :  { %v100_v53 = vpop.permute.xlu1 %99  ;;  %v95_v54 = vpop.permute.xlu0 %94  ;;  %v1537_v60 = vsub.f32 %v1510_v45, %v179_v50  ;;  %1250 = vpow2.f32 %v305_v10 }
  0x86   :  { %v504_v9 = vadd.f32 %v1196_v7, %v503_v0  ;;  %v148_v16 = vsub.f32 %v1503_v39, %v95_v54  ;;  %v149_v23 = vsub.f32 %v1503_v39, %v100_v53 }
  0x87   :  { %v276_v3 = vand.u32 2147483647, %v1537_v60 }
  0x88   :  { %v505_v15 = vadd.f32 %v1197_v13, %v504_v9  ;;  %vm1578_vm6 = vcmp.gt.f32.partialorder %v148_v16, 0.0  ;;  %vm1590_vm7 = vcmp.gt.f32.partialorder %v149_v23, 0.0  ;;  %v153_v16 = vsub.f32 %v1503_v39, %v1498_v36 }
  0x89   :  { %v292_v12 = vsub.f32 0.0, %v276_v3  ;;  %v1199_v30 = vsel %vm1578_vm6, 1.0, %v1367_v51  ;;  %v1200_v47 = vsel %vm1590_vm7, 1.0, %v1367_v51 }
  0x8a   :  { %v506_v24 = vadd.f32 %v1198_v22, %v505_v15  ;;  %vm1641_vm11 = vcmp.gt.f32.partialorder %v153_v16, 0.0 }
  0x8b   :  { %v311_v18 = vmul.f32 1.442695, %v292_v12  ;;  %v1251_v28 = vpop.eup %1250 }
  0x8c   :  { %v194_v2 = vpop.permute.xlu2 %193  ;;  %v507_v32 = vadd.f32 %v1199_v30, %v506_v24  ;;  %v337_v34 = vadd.f32 1.0, %v1251_v28 }
  0x8d   :  { %v1548_v4 = vpop.permute.xlu1 %114  ;;  %v110_v5 = vpop.permute.xlu0 %109  ;;  %v1559_v11 = vsub.f32 %v1510_v45, %v194_v2  ;;  %1252 = vpow2.f32 %v311_v18 }
  0x8e   :  { %v151_v41 = vsub.f32 %v1503_v39, %v110_v5  ;;  %v508_v50 = vadd.f32 %v1200_v47, %v507_v32  ;;  %v152_v0 = vsub.f32 %v1503_v39, %v1548_v4 }
  0x8f   :  { %v279_v17 = vand.u32 2147483647, %v1559_v11  ;;  %v263_v16 = vmin.f32 %v1559_v11, 0.0 }
  0x90   :  { %vm1611_vm9 = vcmp.gt.f32.partialorder %v151_v41, 0.0  ;;  %v509_v1 = vadd.f32 %v1201_v62, %v508_v50  ;;  %vm1634_vm10 = vcmp.gt.f32.partialorder %v152_v0, 0.0 }
  0x91   :  { %v295_v26 = vsub.f32 0.0, %v279_v17  ;;  %v1202_v5 = vsel %vm1611_vm9, 1.0, %v1367_v51 }
  0x92   :  { %v510_v18 = vadd.f32 %v1202_v5, %v509_v1 }
  0x93   :  { %v317_v33 = vmul.f32 1.442695, %v295_v26  ;;  %v1253_v43 = vpop.eup %1252 }
  0x94   :  { %v209_v21 = vpop.permute.xlu2 %208  ;;  %v340_v57 = vadd.f32 1.0, %v1253_v43 }
  0x95   :  { %v1570_v19 = vpop.permute.xlu1 %129  ;;  %v1572_v20 = vpop.permute.xlu0 %124  ;;  %v1583_v27 = vsub.f32 %v1510_v45, %v209_v21  ;;  %1254 = vpow2.f32 %v317_v33  ;;  %v257_v33 = vmin.f32 %v1522_v49, 0.0 }
  0x96   :  { %1256 = vlog2.f32 %v337_v34  ;;  %v1203_v34 = vsel %vm1634_vm10, 1.0, %v1367_v51 }
  0x97   :  { %v282_v37 = vand.u32 2147483647, %v1583_v27  ;;  %1258 = vlog2.f32 %v340_v57  ;;  %v511_v41 = vadd.f32 %v1203_v34, %v510_v18 }
  0x99   :  { %v298_v55 = vsub.f32 0.0, %v282_v37  ;;  %v154_v37 = vsub.f32 %v1503_v39, %v1572_v20 }
  0x9b   :  { %v323_v6 = vmul.f32 1.442695, %v298_v55  ;;  %v1255_v12 = vpop.eup %1254  ;;  %vm1662_vm12 = vcmp.gt.f32.partialorder %v154_v37, 0.0 }
  0x9c   :  { %v224_v54 = vpop.permute.xlu2 %223  ;;  %v1257_v15 = vpop.eup %1256  ;;  %v343_v22 = vadd.f32 1.0, %v1255_v12 }
  0x9d   :  { %v174_v38 = vpop.permute.xlu1 %173  ;;  %v169_v40 = vpop.permute.xlu0 %168  ;;  %v1624_v7 = vsub.f32 %v1510_v45, %v224_v54  ;;  %v354_v36 = vmul.f32 0.6931472, %v1257_v15  ;;  %v260_v15 = vmin.f32 %v1537_v60, 0.0 }
  0x9e   :  { %v1597_v42 = vsub.f32 %v1510_v45, %v174_v38  ;;  %v1600_v35 = vsub.f32 %v1510_v45, %v169_v40  ;;  %v1259_v32 = vpop.eup %1258 }
  0x9f   :  { %v285_v23 = vand.u32 2147483647, %v1624_v7  ;;  %v360_v0 = vmul.f32 0.6931472, %v1259_v32  ;;  %v269_v14 = vmin.f32 %v1624_v7, 0.0 }
  0xa0   :  { %v275_v52 = vand.u32 2147483647, %v1597_v42  ;;  %v274_v53 = vand.u32 2147483647, %v1600_v35 }
  0xa1   :  { %v301_v43 = vsub.f32 0.0, %v285_v23 }
  0xa2   :  { %v291_v59 = vsub.f32 0.0, %v275_v52  ;;  %v290_v61 = vsub.f32 0.0, %v274_v53 }
  0xa4   :  { %v309_v2 = vmul.f32 1.442695, %v291_v59  ;;  %v307_v3 = vmul.f32 1.442695, %v290_v61  ;;  %v239_v28 = vpop.permute.xlu2 %238  ;;  %v385_v59 = vsub.f32 %v257_v33, %v354_v36  ;;  %v155_v61 = vsub.f32 %v1503_v39, %v1570_v19 }
  0xa5   :  { %v189_v9 = vpop.permute.xlu1 %188  ;;  %v184_v10 = vpop.permute.xlu0 %183  ;;  %v1652_v47 = vsub.f32 %v1510_v45, %v239_v28  ;;  %v1204_v19 = vsel %vm1641_vm11, 1.0, %v1367_v51  ;;  %v1681_v36 = vsub.f32 %v260_v15, %v360_v0 }
  0xa6   :  { %v1627_v13 = vsub.f32 %v1510_v45, %v189_v9  ;;  %v1630_v4 = vsub.f32 %v1510_v45, %v184_v10  ;;  %1260 = vpow2.f32 %v309_v2  ;;  %v512_v18 = vadd.f32 %v1204_v19, %v511_v41 }
  0xa7   :  { %1262 = vpow2.f32 %v307_v3  ;;  %v329_v3 = vmul.f32 1.442695, %v301_v43  ;;  %v288_v5 = vand.u32 2147483647, %v1652_v47  ;;  %vm1674_vm13 = vcmp.gt.f32.partialorder %v155_v61, 0.0 }
  0xa8   :  { %v278_v21 = vand.u32 2147483647, %v1627_v13  ;;  %1264 = vpow2.f32 %v323_v6  ;;  %v277_v24 = vand.u32 2147483647, %v1630_v4  ;;  %v259_v41 = vmin.f32 %v1597_v42, 0.0 }
  0xa9   :  { %1266 = vlog2.f32 %v343_v22  ;;  %v401_v22 = vmax.f32 %v385_v59, -15.424949  ;;  %v261_v46 = vmin.f32 %v1630_v4, 0.0 }
  0xaa   :  { %v294_v26 = vsub.f32 0.0, %v278_v21  ;;  %v293_v30 = vsub.f32 0.0, %v277_v24  ;;  %v1205_v24 = vsel %vm1662_vm12, 1.0, %v1367_v51 }
  0xac   :  { %v315_v38 = vmul.f32 1.442695, %v294_v26  ;;  %v1261_v40 = vpop.eup %1260  ;;  %v313_v49 = vmul.f32 1.442695, %v293_v30  ;;  %v304_v30 = vsub.f32 0.0, %v288_v5  ;;  %v1206_v5 = vsel %vm1674_vm13, 1.0, %v1367_v51 }
  0xad   :  { %v204_v50 = vpop.permute.xlu1 %203  ;;  %v199_v52 = vpop.permute.xlu0 %198  ;;  %v339_v54 = vadd.f32 1.0, %v1261_v40 }
  0xae   :  { %v1263_v53 = vpop.eup %1262  ;;  %v1655_v55 = vsub.f32 %v1510_v45, %v204_v50  ;;  %v1658_v57 = vsub.f32 %v1510_v45, %v199_v52  ;;  %1268 = vpow2.f32 %v315_v38  ;;  %v258_v50 = vmin.f32 %v1600_v35, 0.0 }
  0xaf   :  { %v1265_v20 = vpop.eup %1264  ;;  %v338_v62 = vadd.f32 1.0, %v1263_v53  ;;  %1270 = vlog2.f32 %v339_v54  ;;  %v335_v61 = vmul.f32 1.442695, %v304_v30  ;;  %v404_v35 = vmax.f32 %v1681_v36, -15.424949 }
  0xb0   :  { %v281_v2 = vand.u32 2147483647, %v1655_v55  ;;  %v280_v6 = vand.u32 2147483647, %v1658_v57  ;;  %v346_v9 = vadd.f32 1.0, %v1265_v20  ;;  %v1267_v12 = vpop.eup %1266 }
  0xb1   :  { %1272 = vlog2.f32 %v338_v62  ;;  %v366_v53 = vmul.f32 0.6931472, %v1267_v12  ;;  %v266_v62 = vmin.f32 %v1583_v27, 0.0 }
  0xb2   :  { %1274 = vpow2.f32 %v313_v49  ;;  %v297_v10 = vsub.f32 0.0, %v281_v2  ;;  %v296_v21 = vsub.f32 0.0, %v280_v6  ;;  %v513_v6 = vadd.f32 %v1205_v24, %v512_v18 }
  0xb3   :  { %1276 = vpow2.f32 %v329_v3 }
  0xb4   :  { %v321_v26 = vmul.f32 1.442695, %v297_v10  ;;  %v1269_v28 = vpop.eup %1268  ;;  %v319_v60 = vmul.f32 1.442695, %v296_v21  ;;  %1278 = vlog2.f32 %v346_v9  ;;  %v433_v9 = vsel %vm1517_vm1, %v401_v22, 0.0 }
  0xb5   :  { %v219_v32 = vpop.permute.xlu1 %218  ;;  %v214_v11 = vpop.permute.xlu0 %213  ;;  %v342_v34 = vadd.f32 1.0, %v1269_v28  ;;  %v1700_v21 = vsub.f32 %v263_v16, %v366_v53  ;;  %v262_v28 = vmin.f32 %v1627_v13, 0.0 }
  0xb6   :  { %v1271_v33 = vpop.eup %1270  ;;  %v1684_v37 = vsub.f32 %v1510_v45, %v219_v32  ;;  %v1687_v38 = vsub.f32 %v1510_v45, %v214_v11  ;;  %1280 = vpow2.f32 %v321_v26 }
  0xb7   :  { %v1273_v40 = vpop.eup %1272  ;;  %v358_v43 = vmul.f32 0.6931472, %v1271_v33  ;;  %1282 = vlog2.f32 %v342_v34 }
  0xb8   :  { %v1275_v52 = vpop.eup %1274  ;;  %v356_v54 = vmul.f32 0.6931472, %v1273_v40  ;;  %v284_v49 = vand.u32 2147483647, %v1684_v37  ;;  %1284 = vpow2.f32 %v319_v60  ;;  %v283_v42 = vand.u32 2147483647, %v1687_v38 }
  0xb9   :  { %v387_v20 = vsub.f32 %v259_v41, %v358_v43  ;;  %v341_v59 = vadd.f32 1.0, %v1275_v52  ;;  %v1277_v3 = vpop.eup %1276 }
  0xba   :  { %v386_v0 = vsub.f32 %v258_v50, %v356_v54  ;;  %v300_v2 = vsub.f32 0.0, %v284_v49  ;;  %v1279_v19 = vpop.eup %1278  ;;  %v299_v27 = vsub.f32 0.0, %v283_v42  ;;  %v349_v34 = vadd.f32 1.0, %v1277_v3 }
  0xbb   :  { %1286 = vlog2.f32 %v341_v59  ;;  %v403_v26 = vmax.f32 %v387_v20, -15.424949  ;;  %v372_v13 = vmul.f32 0.6931472, %v1279_v19  ;;  %v514_v50 = vadd.f32 %v1206_v5, %v513_v6 }
  0xbc   :  { %v402_v10 = vmax.f32 %v386_v0, -15.424949  ;;  %v327_v12 = vmul.f32 1.442695, %v300_v2  ;;  %v1281_v15 = vpop.eup %1280  ;;  %1288 = vpow2.f32 %v335_v61  ;;  %v325_v48 = vmul.f32 1.442695, %v299_v27 }
  0xbd   :  { %v234_v36 = vpop.permute.xlu1 %233  ;;  %v229_v30 = vpop.permute.xlu0 %228  ;;  %v345_v24 = vadd.f32 1.0, %v1281_v15  ;;  %v435_v52 = vsel %vm1530_vm2, %v403_v26, 0.0  ;;  %v407_v20 = vmax.f32 %v1700_v21, -15.424949  ;;  %v1719_v4 = vsub.f32 %v266_v62, %v372_v13 }
  0xbe   :  { %v1283_v60 = vpop.eup %1282  ;;  %v434_v18 = vsel %vm1512_vm0, %v402_v10, 0.0  ;;  %1290 = vpow2.f32 %v327_v12  ;;  %v1706_v33 = vsub.f32 %v1510_v45, %v234_v36  ;;  %v1709_v16 = vsub.f32 %v1510_v45, %v229_v30 }
  0xbf   :  { %v1285_v22 = vpop.eup %1284  ;;  %v481_v32 = vadd.f32 %v434_v18, %v433_v9  ;;  %v364_v11 = vmul.f32 0.6931472, %v1283_v60  ;;  %1292 = vlog2.f32 %v345_v24  ;;  %v436_v45 = vsel %vm1543_vm3, %v404_v35, 0.0 }
  0xc0   :  { %v344_v40 = vadd.f32 1.0, %v1285_v22  ;;  %1294 = vpow2.f32 %v325_v48  ;;  %v287_v54 = vand.u32 2147483647, %v1706_v33  ;;  %v286_v61 = vand.u32 2147483647, %v1709_v16 }
  0xc1   :  { %v1287_v41 = vpop.eup %1286  ;;  %v390_v43 = vsub.f32 %v262_v28, %v364_v11  ;;  %v482_v59 = vadd.f32 %v481_v32, %v435_v52  ;;  %v265_v3 = vmin.f32 %v1655_v55, 0.0  ;;  %v264_v36 = vmin.f32 %v1658_v57, 0.0 }
  0xc2   :  { %v362_v53 = vmul.f32 0.6931472, %v1287_v41  ;;  %1296 = vlog2.f32 %v344_v40  ;;  %v1289_v49 = vpop.eup %1288  ;;  %v303_v56 = vsub.f32 0.0, %v287_v54  ;;  %v302_v6 = vsub.f32 0.0, %v286_v61 }
  0xc3   :  { %1298 = vlog2.f32 %v349_v34  ;;  %v406_v42 = vmax.f32 %v390_v43, -15.424949  ;;  %v483_v62 = vadd.f32 %v482_v59, %v436_v45  ;;  %v352_v32 = vadd.f32 1.0, %v1289_v49 }
  0xc4   :  { %v1291_v0 = vpop.eup %1290  ;;  %v389_v2 = vsub.f32 %v261_v46, %v362_v53  ;;  %v333_v10 = vmul.f32 1.442695, %v303_v56  ;;  %v331_v26 = vmul.f32 1.442695, %v302_v6  ;;  %v410_v34 = vmax.f32 %v1719_v4, -15.424949 }
  0xc5   :  { %v348_v5 = vadd.f32 1.0, %v1291_v0  ;;  %v140_v19 = vpop.permute.xlu1 %139  ;;  %v135_v9 = vpop.permute.xlu0 %134  ;;  %v439_v43 = vsel %vm1578_vm6, %v407_v20, 0.0  ;;  %v271_v58 = vmin.f32 %v1706_v33, 0.0 }
  0xc6   :  { %v1293_v63 = vpop.eup %1292  ;;  %v405_v35 = vmax.f32 %v389_v2, -15.424949  ;;  %v157_v12 = vsub.f32 %v1503_v39, %v140_v19  ;;  %v156_v27 = vsub.f32 %v1503_v39, %v135_v9  ;;  %v438_v39 = vsel %vm1564_vm5, %v406_v42, 0.0 }
  0xc7   :  { %v1295_v15 = vpop.eup %1294  ;;  %v370_v21 = vmul.f32 0.6931472, %v1293_v63  ;;  %1300 = vlog2.f32 %v348_v5  ;;  %v267_v2 = vmin.f32 %v1687_v38, 0.0 }
  0xc8   :  { %v1297_v28 = vpop.eup %1296  ;;  %v437_v55 = vsel %vm1554_vm4, %v405_v35, 0.0  ;;  %v347_v30 = vadd.f32 1.0, %v1295_v15  ;;  %1302 = vpow2.f32 %v333_v10  ;;  %vm1729_vm14 = vcmp.gt.f32.partialorder %v157_v12, 0.0 }
  0xc9   :  { %v484_v60 = vadd.f32 %v483_v62, %v437_v55  ;;  %v393_v18 = vsub.f32 %v265_v3, %v370_v21  ;;  %v368_v24 = vmul.f32 0.6931472, %v1297_v28  ;;  %1304 = vpow2.f32 %v331_v26  ;;  %v1299_v48 = vpop.eup %1298 }
  0xca   :  { %1306 = vlog2.f32 %v347_v30  ;;  %vm1733_vm15 = vcmp.gt.f32.partialorder %v156_v27, 0.0  ;;  %v1208_v53 = vsel %vm1729_vm14, 1.0, %v1367_v51  ;;  %v378_v49 = vmul.f32 0.6931472, %v1299_v48 }
  0xcb   :  { %v485_v57 = vadd.f32 %v484_v60, %v438_v39  ;;  %v392_v11 = vsub.f32 %v264_v36, %v368_v24  ;;  %v1207_v13 = vsel %vm1733_vm15, 1.0, %v1367_v51  ;;  %v409_v46 = vmax.f32 %v393_v18, -15.424949 }
  0xcc   :  { %v515_v40 = vadd.f32 %v1207_v13, %v514_v50  ;;  %1308 = vlog2.f32 %v352_v32  ;;  %v268_v50 = vmin.f32 %v1684_v37, 0.0  ;;  %v397_v31 = vsub.f32 %v269_v14, %v378_v49 }
  0xcd   :  { %v1301_v41 = vpop.eup %1300  ;;  %v408_v52 = vmax.f32 %v392_v11, -15.424949  ;;  %v486_v45 = vadd.f32 %v485_v57, %v439_v43  ;;  %v441_v51 = vsel %vm1602_vm8, %v409_v46, 0.0  ;;  %v442_v35 = vsel %vm1611_vm9, %v410_v34, 0.0 }
  0xce   :  { %v1303_v54 = vpop.eup %1302  ;;  %v376_v59 = vmul.f32 0.6931472, %v1301_v41  ;;  %v516_v61 = vadd.f32 %v1208_v53, %v515_v40  ;;  %v413_v44 = vmax.f32 %v397_v31, -15.424949  ;;  %v270_v30 = vmin.f32 %v1709_v16, 0.0 }
  0xcf   :  { %v1305_v0 = vpop.eup %1304  ;;  %v440_v7 = vsel %vm1590_vm7, %v408_v52, 0.0  ;;  %v351_v25 = vadd.f32 1.0, %v1303_v54  ;;  %v272_v39 = vmin.f32 %v1652_v47, 0.0 }
  0xd0   :  { %v1307_v20 = vpop.eup %1306  ;;  %v487_v4 = vadd.f32 %v486_v45, %v440_v7  ;;  %v350_v56 = vadd.f32 1.0, %v1305_v0  ;;  %v517_v42 = vrot.slane %v516_v61, 4  ;;  %v396_v3 = vsub.f32 %v268_v50, %v376_v59 }
  0xd1   :  { %v374_v5 = vmul.f32 0.6931472, %v1307_v20  ;;  %1310 = vlog2.f32 %v351_v25  ;;  %v445_v33 = vsel %vm1662_vm12, %v413_v44, 0.0 }
  0xd2   :  { %v488_v6 = vadd.f32 %v487_v4, %v441_v51  ;;  %1312 = vlog2.f32 %v350_v56  ;;  %v518_v19 = vadd.f32 %v517_v42, %v516_v61  ;;  %v1309_v37 = vpop.eup %1308  ;;  %v412_v10 = vmax.f32 %v396_v3, -15.424949 }
  0xd3   :  { %v395_v9 = vsub.f32 %v267_v2, %v374_v5  ;;  %v384_v17 = vmul.f32 0.6931472, %v1309_v37 }
  0xd4   :  { %v519_v63 = vrot.slane %v518_v19, 2  ;;  %v489_v12 = vadd.f32 %v488_v6, %v442_v35  ;;  %v444_v36 = vsel %vm1641_vm11, %v412_v10, 0.0 }
  0xd5   :  { %v411_v38 = vmax.f32 %v395_v9, -15.424949  ;;  %v400_v11 = vsub.f32 %v272_v39, %v384_v17 }
  0xd6   :  { %v520_v27 = vadd.f32 %v519_v63, %v518_v19 }
  0xd7   :  { %v1311_v15 = vpop.eup %1310  ;;  %v443_v62 = vsel %vm1634_vm10, %v411_v38, 0.0  ;;  %v416_v14 = vmax.f32 %v400_v11, -15.424949 }
  0xd8   :  { %v1313_v21 = vpop.eup %1312  ;;  %v490_v26 = vadd.f32 %v489_v12, %v443_v62  ;;  %v382_v28 = vmul.f32 0.6931472, %v1311_v15  ;;  %v521_v55 = vrot.slane %v520_v27, 1 }
  0xd9   :  { %v380_v60 = vmul.f32 0.6931472, %v1313_v21  ;;  %v448_v47 = vsel %vm1729_vm14, %v416_v14, 0.0 }
  0xda   :  { %v399_v18 = vsub.f32 %v271_v58, %v382_v28  ;;  %v491_v24 = vadd.f32 %v490_v26, %v444_v36  ;;  %v522_v48 = vadd.f32 %v521_v55, %v520_v27 }
  0xdb   :  { %v398_v57 = vsub.f32 %v270_v30, %v380_v60 }
  0xdc   :  { %524 = vst [vmem:[#allocation4] sm:$0x1] %v522_v48  ;;  %v415_v29 = vmax.f32 %v399_v18, -15.424949  ;;  %v492_v13 = vadd.f32 %v491_v24, %v445_v33 }
  0xdd   :  { %v414_v32 = vmax.f32 %v398_v57, -15.424949  ;;  %1182 = dma.vmem_to_hbm [thread:$0]  %s1178_s3, 16, %s1180_s11, [#allocation5]  }
  0xde   :  { %v447_v40 = vsel %vm1733_vm15, %v415_v29, 0.0 }
  0xdf   :  { %v446_v16 = vsel %vm1674_vm13, %v414_v32, 0.0 }
  0xe0   :  { %v493_v34 = vadd.f32 %v492_v13, %v446_v16 }
  0xe2   :  { %v494_v41 = vadd.f32 %v493_v34, %v447_v40 }
  0xe4   :  { %v495_v1 = vadd.f32 %v494_v41, %v448_v47 }
  0xe6   :  { %v496_v43 = vrot.slane %v495_v1, 4 }
  0xe8   :  { %v497_v46 = vadd.f32 %v496_v43, %v495_v1 }
  0xea   :  { %v498_v52 = vrot.slane %v497_v46, 2 }
  0xec   :  { %v499_v53 = vadd.f32 %v498_v52, %v497_v46 }
  0xee   :  { %v500_v23 = vrot.slane %v499_v53, 1 }
  0xf0   :  { %v501_v54 = vadd.f32 %v500_v23, %v499_v53 }
  0xf2   :  { %523 = vst [vmem:[#allocation2] sm:$0x1] %v501_v54 }
  0xf3   :  { %1171 = dma.vmem_to_hbm [thread:$0]  %s1167_s12, 16, %s1169_s15, [#allocation3]  }
  0xf4   :  { %1362 = dma.done.wait [#allocation3], 16  }
  0xf5   :  { %1363 = vsyncadd [#allocation3], 4294967280 }
  0xf6   :  { %1364 = dma.done.wait [#allocation5], 16  }
  0xf7   :  { %1365 = vsyncadd [#allocation5], 4294967280 }
  0xf8   :  { %1191 = vsyncpa [#allocation3], 1 }
  0xf9   :  { %1192 = vsyncpa [#allocation5], 1 }

</bundles_post_ra>
